<compile_context>
chip_gen: v5e
topology: v5e:2x2
jax: 0.10.0
libtpu: 0.0.40
codegen_flags: <defaults>
</compile_context>

<pallas_src>
import jax
import jax.numpy as jnp
from jax.experimental import pallas as pl
from jax.experimental.pallas import tpu as pltpu


# ---------------------------------------------------------------------------
# Fused MLP kernel
# ---------------------------------------------------------------------------
def _make_mlp_kernel(num_linear):
    """Fused (Linear -> ReLU)*(L-1) -> Linear body, fully resident in VMEM.

    Dropout is identity in eval mode; norm=False / tailact=False in the
    default MLP config, so no LayerNorm is emitted.
    """

    def kernel(*refs):
        x_ref = refs[0]
        o_ref = refs[-1]
        wb = refs[1:-1]                      # interleaved (w0, b0, w1, b1, ...)
        h = x_ref[...]
        for li in range(num_linear):
            w = wb[2 * li][...]
            b = wb[2 * li + 1][...]          # (1, f_out) -> broadcasts over rows
            h = jnp.dot(h, w, preferred_element_type=jnp.float32) + b
            if li < num_linear - 1:
                h = jnp.maximum(h, 0.0)      # ReLU; Dropout == identity at eval
        o_ref[...] = h.astype(o_ref.dtype)

    return kernel


# ---------------------------------------------------------------------------
# Wrapper
# ---------------------------------------------------------------------------
def _round_up(x, m):
    return (x + m - 1) // m * m


def mlp_forward(x, weights, biases, *, tile_m=512):
    """Pallas forward of MLP(in, hidden, out) in eval mode, then `.squeeze()`.

    x:       (batch, in_channels) float32
    weights: list of (f_in, f_out) arrays (PyTorch Linear weight, transposed)
    biases:  list of (f_out,) arrays
    """
    assert len(weights) == len(biases) and len(weights) >= 1
    num_linear = len(weights)
    batch, f_in = x.shape
    feat_dims = [f_in] + [int(w.shape[1]) for w in weights]
    f_out = feat_dims[-1]

    # Pad only the *intermediate* (hidden) feature dims to 128 lanes so
    # weights / intermediate activations are lane-dense.  The batch-sized
    # input and output keep their true widths (legal: block dim == full array
    # dim), so the big tensors see no padding-induced HBM inflation.
    pdims = list(feat_dims)
    for i in range(1, num_linear):
        pdims[i] = _round_up(feat_dims[i], 128)

    # Row (batch) tiling: sublane axis only needs a multiple of 8.
    rows8 = _round_up(batch, 8)
    tm = min(_round_up(tile_m, 8), rows8)
    batch_p = _round_up(batch, tm)
    num_tiles = batch_p // tm

    x = x.astype(jnp.float32)
    x_p = x if batch_p == batch else jnp.pad(x, ((0, batch_p - batch), (0, 0)))

    # Weight / bias padding (tiny tensors; trace-time only under jax.jit).
    wb_args, wb_specs = [], []
    for li in range(num_linear):
        fi, fo = feat_dims[li], feat_dims[li + 1]
        pi, po = pdims[li], pdims[li + 1]
        w = weights[li].astype(jnp.float32)
        b = biases[li].astype(jnp.float32)
        w_p = w if (pi, po) == (fi, fo) else jnp.pad(w, ((0, pi - fi), (0, po - fo)))
        b_p = (b if po == fo else jnp.pad(b, (0, po - fo))).reshape(1, po)
        wb_args += [w_p, b_p]
        # Grid-invariant whole-array blocks: DMA'd to VMEM once, reused by
        # every row tile.
        # TODO(synk): for large hidden sizes (esp. v7x's 64 MiB VMEM) these
        # resident weights should be single-buffered (pipeline_mode=
        # pl.Buffered(1)) and/or K/N-tiled with an inner loop, and optionally
        # cast to bf16; unnecessary at these shapes.
        wb_specs += [
            pl.BlockSpec((pi, po), lambda i: (0, 0)),
            pl.BlockSpec((1, po), lambda i: (0, 0)),
        ]

    # Advisory cost estimate on TRUE (unpadded) shapes.
    flops = sum(2 * batch * feat_dims[i] * feat_dims[i + 1]
                for i in range(num_linear))
    bytes_accessed = 4 * (batch * f_in + batch * f_out
                          + sum(feat_dims[i] * feat_dims[i + 1] + feat_dims[i + 1]
                                for i in range(num_linear)))

    out_p = pl.pallas_call(
        _make_mlp_kernel(num_linear),
        out_shape=jax.ShapeDtypeStruct((batch_p, f_out), jnp.float32),
        grid=(num_tiles,),
        in_specs=[pl.BlockSpec((tm, f_in), lambda i: (i, 0))] + wb_specs,
        out_specs=pl.BlockSpec((tm, f_out), lambda i: (i, 0)),
        compiler_params=pltpu.CompilerParams(
            dimension_semantics=("parallel",)),
        cost_estimate=pl.CostEstimate(
            flops=flops, transcendentals=0, bytes_accessed=bytes_accessed),
    )(x_p, *wb_args)

    out = out_p if batch_p == batch else out_p[:batch]
    return jnp.squeeze(out)                  # matches `x.squeeze()` in the module


# Jitted entry point: weight pads / casts are traced once per shape instead of
# being re-emitted on every call.
mlp_forward_jit = jax.jit(mlp_forward, static_argnames=("tile_m",))


# ---------------------------------------------------------------------------
# Pure-JAX reference
# ---------------------------------------------------------------------------
def reference_forward(x, weights, biases):
    h = x
    for li in range(len(weights)):
        h = h @ weights[li] + biases[li]
        if li < len(weights) - 1:
            h = jnp.maximum(h, 0.0)          # ReLU; Dropout identity at eval
    return jnp.squeeze(h)


if __name__ == "__main__":
    key = jax.random.PRNGKey(0)

    BATCH = 256          # node/edge batch
    IN_CHANNELS = 16
    HIDDEN_CHANNELS = 32
    OUT_CHANNELS = 1     # exercises the trailing .squeeze()

    k_x, k_w1, k_b1, k_w2, k_b2 = jax.random.split(key, 5)

    x = jax.random.normal(k_x, (BATCH, IN_CHANNELS), dtype=jnp.float32)

    def lin_init(kw, kb, fan_in, fan_out):
        lim = 1.0 / (float(fan_in) ** 0.5)
        w = jax.random.uniform(kw, (fan_in, fan_out), jnp.float32, -lim, lim)
        b = jax.random.uniform(kb, (fan_out,), jnp.float32, -lim, lim)
        return w, b

    w1, b1 = lin_init(k_w1, k_b1, IN_CHANNELS, HIDDEN_CHANNELS)
    w2, b2 = lin_init(k_w2, k_b2, HIDDEN_CHANNELS, OUT_CHANNELS)
    weights = [w1, w2]
    biases = [b1, b2]

    out = mlp_forward_jit(x, weights, biases)
    out = jax.block_until_ready(out)

    ref = reference_forward(x, weights, biases)
    assert out.shape == ref.shape == (BATCH,)
    assert jnp.allclose(out, ref, atol=1e-5, rtol=1e-5)

    print("KERNEL_OK")
</pallas_src>

<mosaic_0001>
module attributes {stable_mosaic.version = 11 : i64} {
  func.func @kernel(%arg0: i32, %arg1: memref<256x16xf32, #tpu.memory_space<vmem>>, %arg2: memref<16x128xf32, #tpu.memory_space<vmem>>, %arg3: memref<1x128xf32, #tpu.memory_space<vmem>>, %arg4: memref<128x1xf32, #tpu.memory_space<vmem>>, %arg5: memref<1x1xf32, #tpu.memory_space<vmem>>, %arg6: memref<256x1xf32, #tpu.memory_space<vmem>>) attributes {dimension_semantics = [#tpu.dimension_semantics<parallel>], iteration_bounds = array<i64: 1>, scalar_prefetch = 0 : i64, scratch_operands = 0 : i64, tpu.core_type = #tpu.core_type<tc>, window_params = [{transform_indices = @transform_0, window_bounds = array<i64: 256, 16>}, {pipeline_mode = #tpu.pipeline_mode<synchronous>, transform_indices = @transform_1, window_bounds = array<i64: 16, 128>}, {pipeline_mode = #tpu.pipeline_mode<synchronous>, transform_indices = @transform_2, window_bounds = array<i64: 1, 128>}, {pipeline_mode = #tpu.pipeline_mode<synchronous>, transform_indices = @transform_3, window_bounds = array<i64: 128, 1>}, {pipeline_mode = #tpu.pipeline_mode<synchronous>, transform_indices = @transform_4, window_bounds = array<i64: 1, 1>}, {transform_indices = @transform_5, window_bounds = array<i64: 256, 1>}]} {
    %c0 = arith.constant 0 : index
    %c0_0 = arith.constant 0 : index
    %0 = vector.load %arg1[%c0, %c0_0] : memref<256x16xf32, #tpu.memory_space<vmem>>, vector<256x16xf32>
    %c0_1 = arith.constant 0 : index
    %c0_2 = arith.constant 0 : index
    %1 = vector.load %arg2[%c0_1, %c0_2] : memref<16x128xf32, #tpu.memory_space<vmem>>, vector<16x128xf32>
    %c0_3 = arith.constant 0 : index
    %c0_4 = arith.constant 0 : index
    %2 = vector.load %arg3[%c0_3, %c0_4] : memref<1x128xf32, #tpu.memory_space<vmem>>, vector<1x128xf32>
    %cst = arith.constant dense<0.000000e+00> : vector<256x128xf32>
    %3 = tpu.matmul %0, %1, %cst {dimension_numbers = #tpu.dot_dimension_numbers<[1], [0], [0], [1], [0, 0, 1, 1], [], []>} : vector<256x16xf32>, vector<16x128xf32>, vector<256x128xf32> -> vector<256x128xf32>
    %4 = vector.broadcast %2 : vector<1x128xf32> to vector<256x128xf32>
    %5 = arith.addf %3, %4 : vector<256x128xf32>
    %cst_5 = arith.constant 0.000000e+00 : f32
    %6 = vector.broadcast %cst_5 : f32 to vector<256x128xf32>
    %7 = arith.maximumf %5, %6 : vector<256x128xf32>
    %c0_6 = arith.constant 0 : index
    %c0_7 = arith.constant 0 : index
    %8 = vector.load %arg4[%c0_6, %c0_7] : memref<128x1xf32, #tpu.memory_space<vmem>>, vector<128x1xf32>
    %c0_8 = arith.constant 0 : index
    %c0_9 = arith.constant 0 : index
    %9 = vector.load %arg5[%c0_8, %c0_9] : memref<1x1xf32, #tpu.memory_space<vmem>>, vector<1x1xf32>
    %cst_10 = arith.constant dense<0.000000e+00> : vector<256x1xf32>
    %10 = tpu.matmul %7, %8, %cst_10 {dimension_numbers = #tpu.dot_dimension_numbers<[1], [0], [0], [1], [0, 0, 1, 1], [], []>} : vector<256x128xf32>, vector<128x1xf32>, vector<256x1xf32> -> vector<256x1xf32>
    %11 = vector.broadcast %9 : vector<1x1xf32> to vector<256x1xf32>
    %12 = arith.addf %10, %11 : vector<256x1xf32>
    %c0_11 = arith.constant 0 : index
    %c0_12 = arith.constant 0 : index
    %13 = vector.load %arg6[%c0_11, %c0_12] : memref<256x1xf32, #tpu.memory_space<vmem>>, vector<256x1xf32>
    tpu.vector_store %arg6[%c0_11, %c0_12], %12 {strides = array<i32>} : memref<256x1xf32, #tpu.memory_space<vmem>>, vector<256x1xf32>,
    return
  }
  func.func @transform_0(%arg0: i32) -> (i32, i32) {
    %c0_i32 = arith.constant 0 : i32
    %c0_i32_0 = arith.constant 0 : i32
    return %arg0, %c0_i32 : i32, i32
  }
  func.func @transform_1(%arg0: i32) -> (i32, i32) {
    %c0_i32 = arith.constant 0 : i32
    %c0_i32_0 = arith.constant 0 : i32
    %c0_i32_1 = arith.constant 0 : i32
    return %c0_i32, %c0_i32_0 : i32, i32
  }
  func.func @transform_2(%arg0: i32) -> (i32, i32) {
    %c0_i32 = arith.constant 0 : i32
    %c0_i32_0 = arith.constant 0 : i32
    %c0_i32_1 = arith.constant 0 : i32
    return %c0_i32, %c0_i32_0 : i32, i32
  }
  func.func @transform_3(%arg0: i32) -> (i32, i32) {
    %c0_i32 = arith.constant 0 : i32
    %c0_i32_0 = arith.constant 0 : i32
    %c0_i32_1 = arith.constant 0 : i32
    return %c0_i32, %c0_i32_0 : i32, i32
  }
  func.func @transform_4(%arg0: i32) -> (i32, i32) {
    %c0_i32 = arith.constant 0 : i32
    %c0_i32_0 = arith.constant 0 : i32
    %c0_i32_1 = arith.constant 0 : i32
    return %c0_i32, %c0_i32_0 : i32, i32
  }
  func.func @transform_5(%arg0: i32) -> (i32, i32) {
    %c0_i32 = arith.constant 0 : i32
    %c0_i32_0 = arith.constant 0 : i32
    return %arg0, %c0_i32 : i32, i32
  }
}

</mosaic_0001>

<bundles_post_ra>
// kernel: mlp_forward.1
= control target key start
LH: loop header
LB: loop body
LE: loop exit
PB: predicated region body
PF: predicated region fallthrough
CT: control target
= control target key end

     0   :  { %vm60_vm0 = vcmask 130048   ;;  %vm435_vm1 = vcmask 7168   ;;  %s954_s1 = inlined_call_operand.vmem [shape: f32[16,128], index: 1, kind: input, shape index: {}]   ;;  %s955_s0 = inlined_call_operand.vmem [shape: f32[256,16], index: 0, kind: input, shape index: {}]   ;;  %s956_s2 = inlined_call_operand.vmem [shape: f32[1,128], index: 2, kind: input, shape index: {}]   ;;  %s957_s3 = inlined_call_operand.vmem [shape: f32[128,1], index: 3, kind: input, shape index: {}]   ;;  %s958_s4 = inlined_call_operand.<no memory space> [shape: f32[1,1], index: 4, kind: input, shape index: {}]   ;;  %s959_s5 = inlined_call_operand.vmem [shape: f32[256,1], index: 5, kind: output, shape index: {}]  }
   0x1   :  { %v55_v0 = vld [vmem:[%s954_s1 + $0x8] sm:$0xff]  ;;  %v54_v1 = vld [vmem:[%s954_s1] sm:$0xff]  ;;  %v24_v4 = vld [vmem:[%s955_s0 + $0x10] sm:$0xff] }
   0x2   :  { %171 = vmatpush.msra.mxu0 %v55_v0  ;;  %v22_v2 = vld [vmem:[%s955_s0] sm:$0xff]  ;;  %504 = vmatpush.msra.mxu3 %v55_v0  ;;  %v23_v3 = vld [vmem:[%s955_s0 + $0x8] sm:$0xff]  ;;  %v25_v5 = vld [vmem:[%s955_s0 + $0x18] sm:$0xff] }
   0x3   :  { %v26_v6 = vld [vmem:[%s955_s0 + $0x20] sm:$0xff]  ;;  %v27_v7 = vld [vmem:[%s955_s0 + $0x28] sm:$0xff]  ;;  %v28_v8 = vld [vmem:[%s955_s0 + $0x30] sm:$0xff] }
   0x4   :  { %172 = vmatpush.msra.mxu0 %v54_v1  ;;  %505 = vmatpush.msra.mxu3 %v54_v1  ;;  %v29_v9 = vld [vmem:[%s955_s0 + $0x38] sm:$0xff]  ;;  %v30_v10 = vld [vmem:[%s955_s0 + $0x40] sm:$0xff]  ;;  %v316_v12 = vld [vmem:[%s957_s3 + $0x70] sm:$0xff] }
   0x5   :  { %472 = vmatmul.msk.f32.vlgmr.msra.gmra.mxu0 %vm60_vm0, %v22_v2  ;;  %v317_v11 = vld [vmem:[%s957_s3 + $0x78] sm:$0xff]  ;;  %v315_v13 = vld [vmem:[%s957_s3 + $0x68] sm:$0xff]  ;;  %v314_v15 = vld [vmem:[%s957_s3 + $0x60] sm:$0xff] }
   0x6   :  { %322 = vmatpush.msra.mxu1 %v317_v11  ;;  %506 = vmatpush.msra.mxu2 %v317_v11  ;;  %v31_v14 = vld [vmem:[%s955_s0 + $0x48] sm:$0xff]  ;;  %v313_v16 = vld [vmem:[%s957_s3 + $0x58] sm:$0xff]  ;;  %v312_v17 = vld [vmem:[%s957_s3 + $0x50] sm:$0xff] }
   0x7   :  { %507 = vmatpush.msrb.mxu3 %v317_v11  ;;  %v311_v18 = vld [vmem:[%s957_s3 + $0x48] sm:$0xff]  ;;  %v32_v19 = vld [vmem:[%s955_s0 + $0x50] sm:$0xff]  ;;  %v310_v20 = vld [vmem:[%s957_s3 + $0x40] sm:$0xff] }
   0x8   :  { %323 = vmatpush.msra.mxu1 %v316_v12  ;;  %508 = vmatpush.msra.mxu2 %v316_v12  ;;  %v309_v21 = vld [vmem:[%s957_s3 + $0x38] sm:$0xff]  ;;  %v308_v22 = vld [vmem:[%s957_s3 + $0x30] sm:$0xff]  ;;  %v307_v23 = vld [vmem:[%s957_s3 + $0x28] sm:$0xff] }
   0x9   :  { %509 = vmatpush.msrb.mxu3 %v316_v12  ;;  %v33_v24 = vld [vmem:[%s955_s0 + $0x58] sm:$0xff]  ;;  %v306_v25 = vld [vmem:[%s957_s3 + $0x20] sm:$0xff]  ;;  %v40_v26 = vld [vmem:[%s955_s0 + $0x90] sm:$0xff] }
   0xa   :  { %324 = vmatpush.msra.mxu1 %v315_v13  ;;  %510 = vmatpush.msra.mxu2 %v315_v13  ;;  %v305_v27 = vld [vmem:[%s957_s3 + $0x18] sm:$0xff]  ;;  %v304_v28 = vld [vmem:[%s957_s3 + $0x10] sm:$0xff]  ;;  %v34_v29 = vld [vmem:[%s955_s0 + $0x60] sm:$0xff] }
   0xb   :  { %511 = vmatpush.msrb.mxu3 %v315_v13  ;;  %v303_v30 = vld [vmem:[%s957_s3 + $0x8] sm:$0xff]  ;;  %v302_v31 = vld [vmem:[%s957_s3] sm:$0xff]  ;;  %v41_v32 = vld [vmem:[%s955_s0 + $0x98] sm:$0xff] }
   0xc   :  { %325 = vmatpush.msra.mxu1 %v314_v15  ;;  %512 = vmatpush.msra.mxu2 %v314_v15  ;;  %v35_v33 = vld [vmem:[%s955_s0 + $0x68] sm:$0xff]  ;;  %v42_v34 = vld [vmem:[%s955_s0 + $0xa0] sm:$0xff]  ;;  %v36_v35 = vld [vmem:[%s955_s0 + $0x70] sm:$0xff] }
   0xd   :  { %473 = vmatmul.msk.f32.gmra.mxu0 %vm60_vm0, %v23_v3  ;;  %513 = vmatpush.msrb.mxu3 %v314_v15  ;;  %v43_v36 = vld [vmem:[%s955_s0 + $0xa8] sm:$0xff]  ;;  %v37_v37 = vld [vmem:[%s955_s0 + $0x78] sm:$0xff]  ;;  %v44_v38 = vld [vmem:[%s955_s0 + $0xb0] sm:$0xff] }
   0xe   :  { %326 = vmatpush.msra.mxu1 %v313_v16  ;;  %514 = vmatpush.msra.mxu2 %v313_v16  ;;  %v711_v39 = vld [vmem:[%s956_s2] ss:$0 sm:$0xff]  ;;  %v45_v44 = vld [vmem:[%s955_s0 + $0xb8] sm:$0xff]  ;;  %v39_v46 = vld [vmem:[%s955_s0 + $0x88] sm:$0xff] }
   0xf   :  { %515 = vmatpush.msrb.mxu3 %v313_v16  ;;  %v38_v41 = vld [vmem:[%s955_s0 + $0x80] sm:$0xff]  ;;  %v47_v53 = vld [vmem:[%s955_s0 + $0xc8] sm:$0xff]  ;;  %v48_v57 = vld [vmem:[%s955_s0 + $0xd0] sm:$0xff] }
  0x10   :  { %327 = vmatpush.msra.mxu1 %v312_v17  ;;  %516 = vmatpush.msra.mxu2 %v312_v17  ;;  %v46_v49 = vld [vmem:[%s955_s0 + $0xc0] sm:$0xff]  ;;  %v49_v61 = vld [vmem:[%s955_s0 + $0xd8] sm:$0xff] }
  0x11   :  { %517 = vmatpush.msrb.mxu3 %v312_v17  ;;  %v50_v1 = vld [vmem:[%s955_s0 + $0xe0] sm:$0xff]  ;;  %v53_v13 = vld [vmem:[%s955_s0 + $0xf8] sm:$0xff] }
  0x12   :  { %328 = vmatpush.msra.mxu1 %v311_v18  ;;  %518 = vmatpush.msra.mxu2 %v311_v18 }
  0x13   :  { %519 = vmatpush.msrb.mxu3 %v311_v18 }
  0x14   :  { %329 = vmatpush.msra.mxu1 %v310_v20  ;;  %520 = vmatpush.msra.mxu2 %v310_v20 }
  0x15   :  { %474 = vmatmul.msk.f32.gmra.mxu0 %vm60_vm0, %v24_v4  ;;  %521 = vmatpush.msrb.mxu3 %v310_v20 }
  0x16   :  { %330 = vmatpush.msra.mxu1 %v309_v21  ;;  %522 = vmatpush.msra.mxu2 %v309_v21 }
  0x17   :  { %523 = vmatpush.msrb.mxu3 %v309_v21 }
  0x18   :  { %331 = vmatpush.msra.mxu1 %v308_v22  ;;  %524 = vmatpush.msra.mxu2 %v308_v22 }
  0x19   :  { %525 = vmatpush.msrb.mxu3 %v308_v22  ;;  %v10_v22 = vstv %s958_s4 }
  0x1a   :  { %332 = vmatpush.msra.mxu1 %v307_v23  ;;  %526 = vmatpush.msra.mxu2 %v307_v23  ;;  %11 = vst [vmem:[#allocation2] sm:$0x1] %v10_v22 }
  0x1b   :  { %527 = vmatpush.msrb.mxu3 %v307_v23 }
  0x1c   :  { %333 = vmatpush.msra.mxu1 %v306_v25  ;;  %490 = vmatmul.msk.f32.vlgmr.msra.gmra.mxu3 %vm60_vm0, %v40_v26 }
  0x1d   :  { %475 = vmatmul.msk.f32.gmra.mxu0 %vm60_vm0, %v25_v5  ;;  %528 = vmatpush.msra.mxu2 %v306_v25  ;;  %v51_v5 = vld [vmem:[%s955_s0 + $0xe8] sm:$0xff] }
  0x1e   :  { %529 = vmatpush.msrb.mxu3 %v306_v25  ;;  %334 = vmatpush.msra.mxu1 %v305_v27 }
  0x1f   :  { %530 = vmatpush.msra.mxu2 %v305_v27 }
  0x20   :  { %531 = vmatpush.msrb.mxu3 %v305_v27  ;;  %335 = vmatpush.msra.mxu1 %v304_v28 }
  0x21   :  { %532 = vmatpush.msra.mxu2 %v304_v28 }
  0x22   :  { %533 = vmatpush.msrb.mxu3 %v304_v28  ;;  %336 = vmatpush.msra.mxu1 %v303_v30 }
  0x23   :  { %534 = vmatpush.msra.mxu2 %v303_v30 }
  0x24   :  { %337 = vmatpush.msra.mxu1 %v302_v31  ;;  %491 = vmatmul.msk.f32.gmra.mxu3 %vm60_vm0, %v41_v32 }
  0x25   :  { %476 = vmatmul.msk.f32.gmra.mxu0 %vm60_vm0, %v26_v6  ;;  %536 = vmatpush.msra.mxu2 %v302_v31 }
  0x26   :  { %535 = vmatpush.msrb.mxu3 %v303_v30 }
  0x28   :  { %537 = vmatpush.msrb.mxu3 %v302_v31 }
  0x2c   :  { %492 = vmatmul.msk.f32.gmra.mxu3 %vm60_vm0, %v42_v34 }
  0x2d   :  { %477 = vmatmul.msk.f32.gmra.mxu0 %vm60_vm0, %v27_v7 }
  0x34   :  { %493 = vmatmul.msk.f32.gmra.mxu3 %vm60_vm0, %v43_v36 }
  0x35   :  { %478 = vmatmul.msk.f32.gmra.mxu0 %vm60_vm0, %v28_v8 }
  0x3c   :  { %494 = vmatmul.msk.f32.gmra.mxu3 %vm60_vm0, %v44_v38 }
  0x3d   :  { %479 = vmatmul.msk.f32.gmra.mxu0 %vm60_vm0, %v29_v9  ;;  %v52_v9 = vld [vmem:[%s955_s0 + $0xf0] sm:$0xff] }
  0x44   :  { %495 = vmatmul.msk.f32.gmra.mxu3 %vm60_vm0, %v45_v44 }
  0x45   :  { %480 = vmatmul.msk.f32.gmra.mxu0 %vm60_vm0, %v30_v10 }
  0x4c   :  { %496 = vmatmul.msk.f32.gmra.mxu3 %vm60_vm0, %v46_v49 }
  0x4d   :  { %481 = vmatmul.msk.f32.gmra.mxu0 %vm60_vm0, %v31_v14 }
  0x54   :  { %497 = vmatmul.msk.f32.gmra.mxu3 %vm60_vm0, %v47_v53 }
  0x55   :  { %482 = vmatmul.msk.f32.gmra.mxu0 %vm60_vm0, %v32_v19 }
  0x5c   :  { %498 = vmatmul.msk.f32.gmra.mxu3 %vm60_vm0, %v48_v57 }
  0x5d   :  { %483 = vmatmul.msk.f32.gmra.mxu0 %vm60_vm0, %v33_v24 }
  0x64   :  { %499 = vmatmul.msk.f32.gmra.mxu3 %vm60_vm0, %v49_v61 }
  0x65   :  { %484 = vmatmul.msk.f32.gmra.mxu0 %vm60_vm0, %v34_v29 }
  0x6c   :  { %500 = vmatmul.msk.f32.gmra.mxu3 %vm60_vm0, %v50_v1 }
  0x6d   :  { %485 = vmatmul.msk.f32.gmra.mxu0 %vm60_vm0, %v35_v33 }
  0x74   :  { %501 = vmatmul.msk.f32.gmra.mxu3 %vm60_vm0, %v51_v5 }
  0x75   :  { %486 = vmatmul.msk.f32.gmra.mxu0 %vm60_vm0, %v36_v35 }
  0x7c   :  { %502 = vmatmul.msk.f32.gmra.mxu3 %vm60_vm0, %v52_v9 }
  0x7d   :  { %487 = vmatmul.msk.f32.gmra.mxu0 %vm60_vm0, %v37_v37 }
  0x82   :  { %v174_v40 = vpop.f32.mrf.mxu0 }
  0x83   :  { %v175_v42 = vadd.f32 %v711_v39, %v174_v40 }
  0x84   :  { %503 = vmatmul.msk.f32.gmra.mxu3 %vm60_vm0, %v53_v13 }
  0x85   :  { %v270_v43 = vmax.f32 %v175_v42, 0.0  ;;  %488 = vmatmul.msk.f32.gmra.mxu0 %vm60_vm0, %v38_v41  ;;  %v776_v41 = vld [vmem:[#allocation2] ss:$0 sm:$0xff] }
  0x87   :  { %338 = vmatmul.f32.vlgmr.msra.gmra.mxu1 %v270_v43 }
  0x8a   :  { %v177_v45 = vpop.f32.mrf.mxu0 }
  0x8b   :  { %v178_v47 = vadd.f32 %v711_v39, %v177_v45 }
  0x8d   :  { %v271_v48 = vmax.f32 %v178_v47, 0.0  ;;  %489 = vmatmul.msk.f32.gmra.mxu0 %vm60_vm0, %v39_v46 }
  0x8f   :  { %341 = vmatmul.f32.gmra.mxu1 %v271_v48 }
  0x92   :  { %v180_v50 = vpop.f32.mrf.mxu0 }
  0x93   :  { %v181_v51 = vadd.f32 %v711_v39, %v180_v50 }
  0x95   :  { %v272_v52 = vmax.f32 %v181_v51, 0.0 }
  0x97   :  { %344 = vmatmul.f32.gmra.mxu1 %v272_v52 }
  0x9a   :  { %v183_v54 = vpop.f32.mrf.mxu0 }
  0x9b   :  { %v184_v55 = vadd.f32 %v711_v39, %v183_v54 }
  0x9d   :  { %v273_v56 = vmax.f32 %v184_v55, 0.0 }
  0x9f   :  { %347 = vmatmul.f32.gmra.mxu1 %v273_v56  ;;  %v228_v25 = vpop.f32.mrf.mxu3 }
  0xa0   :  { %v229_v54 = vadd.f32 %v711_v39, %v228_v25 }
  0xa2   :  { %v186_v58 = vpop.f32.mrf.mxu0  ;;  %v288_v57 = vmax.f32 %v229_v54, 0.0 }
  0xa3   :  { %v187_v59 = vadd.f32 %v711_v39, %v186_v58 }
  0xa5   :  { %v274_v60 = vmax.f32 %v187_v59, 0.0 }
  0xa7   :  { %350 = vmatmul.f32.gmra.mxu1 %v274_v60  ;;  %v231_v29 = vpop.f32.mrf.mxu3 }
  0xa8   :  { %v232_v59 = vadd.f32 %v711_v39, %v231_v29 }
  0xaa   :  { %v189_v62 = vpop.f32.mrf.mxu0 }
  0xab   :  { %v190_v63 = vadd.f32 %v711_v39, %v189_v62  ;;  %v289_v62 = vmax.f32 %v232_v59, 0.0 }
  0xad   :  { %v275_v0 = vmax.f32 %v190_v63, 0.0 }
  0xaf   :  { %353 = vmatmul.f32.gmra.mxu1 %v275_v0  ;;  %v234_v33 = vpop.f32.mrf.mxu3 }
  0xb0   :  { %v235_v0 = vadd.f32 %v711_v39, %v234_v33 }
  0xb2   :  { %v192_v2 = vpop.f32.mrf.mxu0 }
  0xb3   :  { %v193_v3 = vadd.f32 %v711_v39, %v192_v2 }
  0xb5   :  { %v276_v4 = vmax.f32 %v193_v3, 0.0  ;;  %v290_v3 = vmax.f32 %v235_v0, 0.0 }
  0xb7   :  { %356 = vmatmul.f32.gmra.mxu1 %v276_v4  ;;  %v237_v37 = vpop.f32.mrf.mxu3 }
  0xb8   :  { %v238_v5 = vadd.f32 %v711_v39, %v237_v37 }
  0xba   :  { %v195_v6 = vpop.f32.mrf.mxu0 }
  0xbb   :  { %v196_v7 = vadd.f32 %v711_v39, %v195_v6 }
  0xbd   :  { %v277_v8 = vmax.f32 %v196_v7, 0.0 }
  0xbf   :  { %359 = vmatmul.f32.gmra.mxu1 %v277_v8  ;;  %v240_v43 = vpop.f32.mrf.mxu3  ;;  %v291_v8 = vmax.f32 %v238_v5, 0.0 }
  0xc2   :  { %v198_v10 = vpop.f32.mrf.mxu0 }
  0xc3   :  { %v199_v11 = vadd.f32 %v711_v39, %v198_v10  ;;  %v241_v10 = vadd.f32 %v711_v39, %v240_v43 }
  0xc5   :  { %v278_v12 = vmax.f32 %v199_v11, 0.0  ;;  %v292_v13 = vmax.f32 %v241_v10, 0.0 }
  0xc7   :  { %362 = vmatmul.f32.gmra.mxu1 %v278_v12  ;;  %v243_v49 = vpop.f32.mrf.mxu3 }
  0xca   :  { %v201_v14 = vpop.f32.mrf.mxu0 }
  0xcb   :  { %v202_v15 = vadd.f32 %v711_v39, %v201_v14 }
  0xcd   :  { %v279_v16 = vmax.f32 %v202_v15, 0.0  ;;  %v244_v15 = vadd.f32 %v711_v39, %v243_v49 }
  0xcf   :  { %365 = vmatmul.f32.gmra.mxu1 %v279_v16  ;;  %v246_v55 = vpop.f32.mrf.mxu3 }
  0xd2   :  { %v204_v17 = vpop.f32.mrf.mxu0 }
  0xd3   :  { %v205_v18 = vadd.f32 %v711_v39, %v204_v17 }
  0xd5   :  { %v280_v19 = vmax.f32 %v205_v18, 0.0  ;;  %v293_v18 = vmax.f32 %v244_v15, 0.0 }
  0xd7   :  { %368 = vmatmul.f32.gmra.mxu1 %v280_v19  ;;  %v249_v60 = vpop.f32.mrf.mxu3 }
  0xda   :  { %v207_v20 = vpop.f32.mrf.mxu0 }
  0xdb   :  { %v208_v21 = vadd.f32 %v711_v39, %v207_v20  ;;  %v247_v20 = vadd.f32 %v711_v39, %v246_v55 }
  0xdd   :  { %v281_v23 = vmax.f32 %v208_v21, 0.0 }
  0xdf   :  { %371 = vmatmul.f32.gmra.mxu1 %v281_v23  ;;  %v252_v1 = vpop.f32.mrf.mxu3 }
  0xe2   :  { %v210_v24 = vpop.f32.mrf.mxu0 }
  0xe3   :  { %v211_v26 = vadd.f32 %v711_v39, %v210_v24  ;;  %v294_v24 = vmax.f32 %v247_v20, 0.0 }
  0xe5   :  { %v282_v27 = vmax.f32 %v211_v26, 0.0 }
  0xe7   :  { %374 = vmatmul.f32.gmra.mxu1 %v282_v27  ;;  %v255_v6 = vpop.f32.mrf.mxu3  ;;  %v250_v27 = vadd.f32 %v711_v39, %v249_v60 }
  0xea   :  { %v213_v28 = vpop.f32.mrf.mxu0 }
  0xeb   :  { %v214_v30 = vadd.f32 %v711_v39, %v213_v28 }
  0xed   :  { %v283_v31 = vmax.f32 %v214_v30, 0.0 }
  0xef   :  { %377 = vmatmul.f32.gmra.mxu1 %v283_v31  ;;  %v258_v11 = vpop.f32.mrf.mxu3  ;;  %v295_v31 = vmax.f32 %v250_v27, 0.0 }
  0xf2   :  { %v216_v32 = vpop.f32.mrf.mxu0 }
  0xf3   :  { %v217_v34 = vadd.f32 %v711_v39, %v216_v32 }
  0xf5   :  { %v284_v35 = vmax.f32 %v217_v34, 0.0  ;;  %v253_v34 = vadd.f32 %v711_v39, %v252_v1 }
  0xf7   :  { %380 = vmatmul.f32.gmra.mxu1 %v284_v35  ;;  %v261_v16 = vpop.f32.mrf.mxu3 }
  0xfa   :  { %v219_v36 = vpop.f32.mrf.mxu0 }
  0xfb   :  { %v220_v38 = vadd.f32 %v711_v39, %v219_v36  ;;  %v296_v36 = vmax.f32 %v253_v34, 0.0 }
  0xfd   :  { %v285_v40 = vmax.f32 %v220_v38, 0.0  ;;  %v256_v38 = vadd.f32 %v711_v39, %v255_v6 }
  0xff   :  { %383 = vmatmul.f32.vlgmr.msra.gmra.mxu2 %v285_v40  ;;  %v264_v21 = vpop.f32.mrf.mxu3 }
 0x100   :  { %v265_v22 = vadd.f32 %v711_v39, %v264_v21 }
 0x102   :  { %v222_v42 = vpop.f32.mrf.mxu0  ;;  %v300_v26 = vmax.f32 %v265_v22, 0.0 }
 0x103   :  { %v223_v44 = vadd.f32 %v711_v39, %v222_v42  ;;  %v297_v42 = vmax.f32 %v256_v38, 0.0 }
 0x104   :  { %v339_v45 = vpop.f32.mrf.mxu1  ;;  %428 = vmatmul.f32.vlgmr.msrb.gmra.mxu3 %v300_v26 }
 0x105   :  { %v286_v46 = vmax.f32 %v223_v44, 0.0  ;;  %v340_v47 = vadd.f32 %v776_v41, %v339_v45  ;;  %v259_v44 = vadd.f32 %v711_v39, %v258_v11 }
 0x107   :  { %436 = vst.msk [vmem:[%s959_s5] sm:$0xff] %vm435_vm1, %v340_v47  ;;  %386 = vmatmul.f32.gmra.mxu2 %v286_v46  ;;  %v267_v28 = vpop.f32.mrf.mxu3  ;;  %v298_v46 = vmax.f32 %v259_v44, 0.0 }
 0x108   :  { %v268_v29 = vadd.f32 %v711_v39, %v267_v28 }
 0x10a   :  { %v225_v48 = vpop.f32.mrf.mxu0  ;;  %v301_v33 = vmax.f32 %v268_v29, 0.0 }
 0x10b   :  { %v226_v50 = vadd.f32 %v711_v39, %v225_v48  ;;  %v262_v48 = vadd.f32 %v711_v39, %v261_v16 }
 0x10c   :  { %v342_v51 = vpop.f32.mrf.mxu1  ;;  %431 = vmatmul.f32.gmra.mxu3 %v301_v33 }
 0x10d   :  { %v287_v52 = vmax.f32 %v226_v50, 0.0  ;;  %v343_v53 = vadd.f32 %v776_v41, %v342_v51  ;;  %v299_v50 = vmax.f32 %v262_v48, 0.0 }
 0x10f   :  { %437 = vst.msk [vmem:[%s959_s5 + $0x8] sm:$0xff] %vm435_vm1, %v343_v53  ;;  %389 = vmatmul.f32.gmra.mxu2 %v287_v52 }
 0x114   :  { %v345_v56 = vpop.f32.mrf.mxu1 }
 0x115   :  { %v346_v58 = vadd.f32 %v776_v41, %v345_v56 }
 0x117   :  { %438 = vst.msk [vmem:[%s959_s5 + $0x10] sm:$0xff] %vm435_vm1, %v346_v58  ;;  %392 = vmatmul.f32.gmra.mxu2 %v288_v57 }
 0x11c   :  { %v348_v61 = vpop.f32.mrf.mxu1 }
 0x11d   :  { %v349_v63 = vadd.f32 %v776_v41, %v348_v61 }
 0x11f   :  { %439 = vst.msk [vmem:[%s959_s5 + $0x18] sm:$0xff] %vm435_vm1, %v349_v63  ;;  %395 = vmatmul.f32.gmra.mxu2 %v289_v62 }
 0x124   :  { %v351_v2 = vpop.f32.mrf.mxu1 }
 0x125   :  { %v352_v4 = vadd.f32 %v776_v41, %v351_v2 }
 0x127   :  { %440 = vst.msk [vmem:[%s959_s5 + $0x20] sm:$0xff] %vm435_vm1, %v352_v4  ;;  %398 = vmatmul.f32.gmra.mxu2 %v290_v3 }
 0x12c   :  { %v354_v7 = vpop.f32.mrf.mxu1 }
 0x12d   :  { %v355_v9 = vadd.f32 %v776_v41, %v354_v7 }
 0x12f   :  { %441 = vst.msk [vmem:[%s959_s5 + $0x28] sm:$0xff] %vm435_vm1, %v355_v9  ;;  %401 = vmatmul.f32.gmra.mxu2 %v291_v8 }
 0x134   :  { %v357_v12 = vpop.f32.mrf.mxu1 }
 0x135   :  { %v358_v14 = vadd.f32 %v776_v41, %v357_v12 }
 0x137   :  { %442 = vst.msk [vmem:[%s959_s5 + $0x30] sm:$0xff] %vm435_vm1, %v358_v14  ;;  %404 = vmatmul.f32.gmra.mxu2 %v292_v13 }
 0x13c   :  { %v360_v17 = vpop.f32.mrf.mxu1 }
 0x13d   :  { %v361_v19 = vadd.f32 %v776_v41, %v360_v17 }
 0x13f   :  { %443 = vst.msk [vmem:[%s959_s5 + $0x38] sm:$0xff] %vm435_vm1, %v361_v19  ;;  %407 = vmatmul.f32.gmra.mxu2 %v293_v18 }
 0x144   :  { %v363_v23 = vpop.f32.mrf.mxu1 }
 0x145   :  { %v364_v25 = vadd.f32 %v776_v41, %v363_v23 }
 0x147   :  { %444 = vst.msk [vmem:[%s959_s5 + $0x40] sm:$0xff] %vm435_vm1, %v364_v25  ;;  %410 = vmatmul.f32.gmra.mxu2 %v294_v24 }
 0x14c   :  { %v366_v30 = vpop.f32.mrf.mxu1 }
 0x14d   :  { %v367_v32 = vadd.f32 %v776_v41, %v366_v30 }
 0x14f   :  { %445 = vst.msk [vmem:[%s959_s5 + $0x48] sm:$0xff] %vm435_vm1, %v367_v32  ;;  %413 = vmatmul.f32.gmra.mxu2 %v295_v31 }
 0x154   :  { %v369_v35 = vpop.f32.mrf.mxu1 }
 0x155   :  { %v370_v37 = vadd.f32 %v776_v41, %v369_v35 }
 0x157   :  { %446 = vst.msk [vmem:[%s959_s5 + $0x50] sm:$0xff] %vm435_vm1, %v370_v37  ;;  %416 = vmatmul.f32.gmra.mxu2 %v296_v36 }
 0x15c   :  { %v372_v40 = vpop.f32.mrf.mxu1 }
 0x15d   :  { %v373_v43 = vadd.f32 %v776_v41, %v372_v40 }
 0x15f   :  { %447 = vst.msk [vmem:[%s959_s5 + $0x58] sm:$0xff] %vm435_vm1, %v373_v43  ;;  %419 = vmatmul.f32.gmra.mxu2 %v297_v42 }
 0x164   :  { %v375_v45 = vpop.f32.mrf.mxu1 }
 0x165   :  { %v376_v47 = vadd.f32 %v776_v41, %v375_v45 }
 0x167   :  { %448 = vst.msk [vmem:[%s959_s5 + $0x60] sm:$0xff] %vm435_vm1, %v376_v47  ;;  %422 = vmatmul.f32.gmra.mxu2 %v298_v46 }
 0x16c   :  { %v378_v49 = vpop.f32.mrf.mxu1 }
 0x16d   :  { %v379_v51 = vadd.f32 %v776_v41, %v378_v49 }
 0x16f   :  { %449 = vst.msk [vmem:[%s959_s5 + $0x68] sm:$0xff] %vm435_vm1, %v379_v51  ;;  %425 = vmatmul.f32.gmra.mxu2 %v299_v50 }
 0x174   :  { %v381_v52 = vpop.f32.mrf.mxu1 }
 0x175   :  { %v382_v53 = vadd.f32 %v776_v41, %v381_v52 }
 0x177   :  { %450 = vst.msk [vmem:[%s959_s5 + $0x70] sm:$0xff] %vm435_vm1, %v382_v53 }
 0x182   :  { %v384_v54 = vpop.f32.mrf.mxu2 }
 0x183   :  { %v385_v39 = vadd.f32 %v776_v41, %v384_v54 }
 0x185   :  { %451 = vst.msk [vmem:[%s959_s5 + $0x78] sm:$0xff] %vm435_vm1, %v385_v39 }
 0x187   :  { %v429_v8 = vpop.f32.mrf.mxu3 }
 0x188   :  { %v430_v10 = vadd.f32 %v776_v41, %v429_v8 }
 0x18a   :  { %v387_v55 = vpop.f32.mrf.mxu2  ;;  %466 = vst.msk [vmem:[%s959_s5 + $0xf0] sm:$0xff] %vm435_vm1, %v430_v10 }
 0x18b   :  { %v388_v56 = vadd.f32 %v776_v41, %v387_v55 }
 0x18d   :  { %452 = vst.msk [vmem:[%s959_s5 + $0x80] sm:$0xff] %vm435_vm1, %v388_v56 }
 0x18f   :  { %v432_v12 = vpop.f32.mrf.mxu3 }
 0x190   :  { %v433_v14 = vadd.f32 %v776_v41, %v432_v12 }
 0x192   :  { %v390_v57 = vpop.f32.mrf.mxu2  ;;  %467 = vst.msk [vmem:[%s959_s5 + $0xf8] sm:$0xff] %vm435_vm1, %v433_v14 }
 0x193   :  { %v391_v58 = vadd.f32 %v776_v41, %v390_v57 }
 0x195   :  { %453 = vst.msk [vmem:[%s959_s5 + $0x88] sm:$0xff] %vm435_vm1, %v391_v58 }
 0x19a   :  { %v393_v59 = vpop.f32.mrf.mxu2 }
 0x19b   :  { %v394_v60 = vadd.f32 %v776_v41, %v393_v59 }
 0x19d   :  { %454 = vst.msk [vmem:[%s959_s5 + $0x90] sm:$0xff] %vm435_vm1, %v394_v60 }
 0x1a2   :  { %v396_v61 = vpop.f32.mrf.mxu2 }
 0x1a3   :  { %v397_v62 = vadd.f32 %v776_v41, %v396_v61 }
 0x1a5   :  { %455 = vst.msk [vmem:[%s959_s5 + $0x98] sm:$0xff] %vm435_vm1, %v397_v62 }
 0x1aa   :  { %v399_v63 = vpop.f32.mrf.mxu2 }
 0x1ab   :  { %v400_v0 = vadd.f32 %v776_v41, %v399_v63 }
 0x1ad   :  { %456 = vst.msk [vmem:[%s959_s5 + $0xa0] sm:$0xff] %vm435_vm1, %v400_v0 }
 0x1b2   :  { %v402_v1 = vpop.f32.mrf.mxu2 }
 0x1b3   :  { %v403_v2 = vadd.f32 %v776_v41, %v402_v1 }
 0x1b5   :  { %457 = vst.msk [vmem:[%s959_s5 + $0xa8] sm:$0xff] %vm435_vm1, %v403_v2 }
 0x1ba   :  { %v405_v3 = vpop.f32.mrf.mxu2 }
 0x1bb   :  { %v406_v4 = vadd.f32 %v776_v41, %v405_v3 }
 0x1bd   :  { %458 = vst.msk [vmem:[%s959_s5 + $0xb0] sm:$0xff] %vm435_vm1, %v406_v4 }
 0x1c2   :  { %v408_v5 = vpop.f32.mrf.mxu2 }
 0x1c3   :  { %v409_v6 = vadd.f32 %v776_v41, %v408_v5 }
 0x1c5   :  { %459 = vst.msk [vmem:[%s959_s5 + $0xb8] sm:$0xff] %vm435_vm1, %v409_v6 }
 0x1ca   :  { %v411_v7 = vpop.f32.mrf.mxu2 }
 0x1cb   :  { %v412_v9 = vadd.f32 %v776_v41, %v411_v7 }
 0x1cd   :  { %460 = vst.msk [vmem:[%s959_s5 + $0xc0] sm:$0xff] %vm435_vm1, %v412_v9 }
 0x1d2   :  { %v414_v11 = vpop.f32.mrf.mxu2 }
 0x1d3   :  { %v415_v13 = vadd.f32 %v776_v41, %v414_v11 }
 0x1d5   :  { %461 = vst.msk [vmem:[%s959_s5 + $0xc8] sm:$0xff] %vm435_vm1, %v415_v13 }
 0x1da   :  { %v417_v15 = vpop.f32.mrf.mxu2 }
 0x1db   :  { %v418_v16 = vadd.f32 %v776_v41, %v417_v15 }
 0x1dd   :  { %462 = vst.msk [vmem:[%s959_s5 + $0xd0] sm:$0xff] %vm435_vm1, %v418_v16 }
 0x1e2   :  { %v420_v17 = vpop.f32.mrf.mxu2 }
 0x1e3   :  { %v421_v18 = vadd.f32 %v776_v41, %v420_v17 }
 0x1e5   :  { %463 = vst.msk [vmem:[%s959_s5 + $0xd8] sm:$0xff] %vm435_vm1, %v421_v18 }
 0x1ea   :  { %v423_v19 = vpop.f32.mrf.mxu2 }
 0x1eb   :  { %v424_v20 = vadd.f32 %v776_v41, %v423_v19 }
 0x1ed   :  { %464 = vst.msk [vmem:[%s959_s5 + $0xe0] sm:$0xff] %vm435_vm1, %v424_v20 }
 0x1f2   :  { %v426_v21 = vpop.f32.mrf.mxu2 }
 0x1f3   :  { %v427_v22 = vadd.f32 %v776_v41, %v426_v21 }
 0x1f5   :  { %465 = vst.msk [vmem:[%s959_s5 + $0xe8] sm:$0xff] %vm435_vm1, %v427_v22 }

</bundles_post_ra>
